<compile_context>
chip_gen: v7x
topology: tpu7x:2x2x1
jax: 0.10.0
libtpu: 0.0.40
codegen_flags: <defaults>
</compile_context>

<pallas_src>
import functools
import math

import jax
import jax.numpy as jnp
from jax.experimental import pallas as pl
from jax.experimental.pallas import tpu as pltpu


def _round_up(a, b):
    return (a + b - 1) // b * b


def _sublane_quantum(dtype):
    return {1: 32, 2: 16, 4: 8}.get(jnp.dtype(dtype).itemsize, 8)


def _vmem_capacity_bytes():
    """Per-core VMEM capacity; conservative fallback (v7x: 64 MiB/TC)."""
    try:
        info = pltpu.get_tpu_info()
        for attr in ("vmem_capacity_bytes", "vmem_size_bytes"):
            v = getattr(info, attr, None)
            if v:
                return int(v)
    except Exception:
        pass
    return 64 << 20


def _choose_tile(dim, target, quantum):
    """Return (tile, padded_dim): padded_dim % tile == 0, tile % quantum == 0."""
    dim_q = _round_up(dim, quantum)
    if dim_q <= target:
        return dim_q, dim_q
    tile = _round_up(target, quantum)
    return tile, _round_up(dim, tile)


def _pissa_kernel(x_ref, wt_ref, bias_ref, at_ref, bt_ref, out_ref,
                  acc_ref, acc_a_ref, *, dim, tn):
    j = pl.program_id(1)
    k = pl.program_id(2)
    nk = pl.num_programs(2)

    # Fold the bias into the accumulator init (saves an epilogue VPU add).
    @pl.when(k == 0)
    def _():
        acc_ref[...] = jnp.broadcast_to(
            bias_ref[...].astype(jnp.float32), acc_ref.shape)

    @pl.when((j == 0) & (k == 0))
    def _():
        acc_a_ref[...] = jnp.zeros_like(acc_a_ref)

    x = x_ref[...]
    # Frozen (residual) QKV projection, accumulated over the K sweep.
    acc_ref[...] += jnp.dot(x, wt_ref[...], preferred_element_type=jnp.float32)

    # LoRA first matmul is j-independent: accumulate it only on the j==0 sweep
    # (scratch persists across grid steps) and reuse the result for j > 0.
    # NOTE: A^T's index_map collapses to block (0, 0) for j > 0, so its DMA is
    # skipped on those sweeps.  Requires j to be an "arbitrary" grid axis.
    @pl.when(j == 0)
    def _():
        acc_a_ref[...] += jnp.dot(x, at_ref[...],
                                  preferred_element_type=jnp.float32)

    # Output tiles entirely inside the K slice have an all-zero B block: skip
    # the epilogue LoRA matmul there (predicate is exact for any dim/tn).
    k_only = (j * tn >= dim) & ((j + 1) * tn <= 2 * dim)

    @pl.when((k == nk - 1) & jnp.logical_not(k_only))
    def _():
        lora = jnp.dot(acc_a_ref[...].astype(bt_ref.dtype), bt_ref[...],
                       preferred_element_type=jnp.float32)
        out_ref[...] = (acc_ref[...] + lora).astype(out_ref.dtype)

    @pl.when((k == nk - 1) & k_only)
    def _():
        out_ref[...] = acc_ref[...].astype(out_ref.dtype)


def prepare_pissa_weights(w_qkv, b_qkv, a_q, b_q, a_v, b_v, scaling,
                          weight_dtype=None, tn_target=None, tk_target=None):
    """One-time packing (hoisted out of the forward path).

    w_qkv: (3*dim, D) nn.Linear layout; a_*: (r, D); b_*: (dim, r).
    weight_dtype=jnp.bfloat16 halves HBM streaming on the memory-bound path.
    """
    out_features, D = w_qkv.shape
    dim = out_features // 3
    r = a_q.shape[0]
    dtype = jnp.dtype(weight_dtype) if weight_dtype is not None else w_qkv.dtype
    scaling = float(scaling)

    w_itemsize = jnp.dtype(dtype).itemsize
    if tn_target is None:
        tn_target = 1024 if w_itemsize <= 2 else 512
    if tk_target is None:
        tk_target = 1024

    tk, D_pad = _choose_tile(D, tk_target, 128)
    tn, N_pad = _choose_tile(out_features, tn_target, 128)
    R_pad = _round_up(2 * r, 128)   # lane-dense rank dim for the fused LoRA pair

    wt = jnp.zeros((D_pad, N_pad), dtype).at[:D, :out_features].set(
        w_qkv.T.astype(dtype))
    bias = jnp.zeros((1, N_pad), dtype).at[0, :out_features].set(
        b_qkv.astype(dtype))

    at = jnp.zeros((D_pad, R_pad), dtype)
    at = at.at[:D, :r].set(a_q.T.astype(dtype))
    at = at.at[:D, r:2 * r].set(a_v.T.astype(dtype))

    bt = jnp.zeros((R_pad, N_pad), dtype)            # scaling pre-folded
    bt = bt.at[:r, :dim].set((b_q.T * scaling).astype(dtype))
    bt = bt.at[r:2 * r, 2 * dim:3 * dim].set((b_v.T * scaling).astype(dtype))

    return dict(wt=wt, bias=bias, at=at, bt=bt, dim=dim,
                D=D, N=out_features, D_pad=D_pad, N_pad=N_pad, R_pad=R_pad,
                tk=tk, tn=tn)


def pissa_forward(x, packed, *, tm_target=None):
    """x: (..., D). Returns (..., 3*dim)."""
    orig_shape = x.shape
    D, N, dim = packed["D"], packed["N"], packed["dim"]
    D_pad, N_pad, R_pad = packed["D_pad"], packed["N_pad"], packed["R_pad"]
    tk, tn = packed["tk"], packed["tn"]

    x_itemsize = jnp.dtype(x.dtype).itemsize
    w_itemsize = jnp.dtype(packed["wt"].dtype).itemsize
    sub_q = _sublane_quantum(x.dtype)
    if tm_target is None:
        tm_target = 1024 if x_itemsize <= 2 else 512

    cap = _vmem_capacity_bytes()
    budget = int(cap * 0.7)

    def vmem_usage(tm):
        blocks = 2 * (tm * tk * x_itemsize          # x       (double-buffered)
                      + tk * tn * w_itemsize        # W^T
                      + tn * w_itemsize             # bias
                      + tk * R_pad * w_itemsize     # A_comb^T
                      + R_pad * tn * w_itemsize     # B_comb^T
                      + tm * tn * x_itemsize)       # out
        scratch = 4 * (tm * tn + tm * R_pad)        # f32 accumulators
        return blocks + scratch

    M = math.prod(orig_shape[:-1])
    tm = min(_round_up(tm_target, sub_q), _round_up(M, sub_q))
    # v7x megacore: keep >= 2 i-tiles whenever M allows so both TCs are busy.
    if M >= 2 * sub_q:
        tm = min(tm, _round_up(-(-M // 2), sub_q))
    while vmem_usage(tm) > budget and tm > sub_q:
        tm = max(sub_q, _round_up(tm // 2, sub_q))
    M_pad = _round_up(M, tm)

    x2 = x.reshape(M, D)
    if (M_pad, D_pad) != (M, D):
        # K-axis zero padding is required for correctness; M padding only when
        # the row count is not already a multiple of the chosen tile.
        x2 = jnp.pad(x2, ((0, M_pad - M), (0, D_pad - D)))

    grid = (M_pad // tm, N_pad // tn, D_pad // tk)

    cost = pl.CostEstimate(
        flops=2 * M * D * N + 2 * M * D * R_pad + 2 * M * R_pad * N,
        transcendentals=0,
        bytes_accessed=(M * D + M * N) * x_itemsize
        + (D * N + D * R_pad + R_pad * N + N) * w_itemsize,
    )

    vmem_limit = int(min(cap * 0.9, max(vmem_usage(tm) * 1.25, 32 << 20)))

    kernel = functools.partial(_pissa_kernel, dim=dim, tn=tn)

    out = pl.pallas_call(
        kernel,
        out_shape=jax.ShapeDtypeStruct((M_pad, N_pad), x.dtype),
        grid_spec=pltpu.PrefetchScalarGridSpec(
            num_scalar_prefetch=0,
            grid=grid,
            in_specs=[
                pl.BlockSpec((tm, tk), lambda i, j, k: (i, k)),        # x
                pl.BlockSpec((tk, tn), lambda i, j, k: (k, j)),        # W^T
                pl.BlockSpec((1, tn), lambda i, j, k: (0, j)),         # bias
                # A_comb^T is only read at j == 0: collapse the block index for
                # j > 0 so Pallas skips the dead DMAs on those sweeps.
                pl.BlockSpec((tk, R_pad),
                             lambda i, j, k: (jnp.where(j == 0, k, 0), 0)),
                pl.BlockSpec((R_pad, tn), lambda i, j, k: (0, j)),     # B_comb^T
            ],
            out_specs=pl.BlockSpec((tm, tn), lambda i, j, k: (i, j)),
            scratch_shapes=[
                pltpu.VMEM((tm, tn), jnp.float32),      # main f32 accumulator
                pltpu.VMEM((tm, R_pad), jnp.float32),   # x @ A_comb^T accumulator
            ],
        ),
        compiler_params=pltpu.CompilerParams(
            # j MUST stay "arbitrary": the LoRA-accumulator carry (j==0 sweep
            # feeds all j>0 epilogues) relies on sequential j/k order per core.
            dimension_semantics=("parallel", "arbitrary", "arbitrary"),
            vmem_limit_bytes=vmem_limit,
        ),
        cost_estimate=cost,
    )(x2, packed["wt"], packed["bias"], packed["at"], packed["bt"])

    if (M_pad, N_pad) != (M, N):
        out = out[:M, :N]
    return out.reshape(*orig_shape[:-1], N)


def make_pissa_params(key, in_features, lora_r, lora_alpha=1.0, dtype=jnp.float32):
    """Deterministic synthetic init mirroring PiSSA.__init__ (SVD split of Q/V)."""
    out_features = 3 * in_features
    dim = in_features
    k1, k2 = jax.random.split(key)
    bound = 1.0 / jnp.sqrt(in_features)
    w = jax.random.uniform(k1, (out_features, in_features), dtype,
                           minval=-bound, maxval=bound)
    b = jax.random.uniform(k2, (out_features,), dtype, minval=-bound, maxval=bound)

    q_w = w[:dim, :]
    v_w = w[2 * dim:, :]
    U_q, S_q, Vh_q = jnp.linalg.svd(q_w.astype(jnp.float32), full_matrices=False)
    U_v, S_v, Vh_v = jnp.linalg.svd(v_w.astype(jnp.float32), full_matrices=False)

    U_q_r, S_q_r, Vh_q_r = U_q[:, :lora_r], S_q[:lora_r], Vh_q[:lora_r, :]
    U_v_r, S_v_r, Vh_v_r = U_v[:, :lora_r], S_v[:lora_r], Vh_v[:lora_r, :]

    q_low = (U_q_r * S_q_r[None, :]) @ Vh_q_r
    v_low = (U_v_r * S_v_r[None, :]) @ Vh_v_r

    w = w.at[:dim, :].add(-q_low.astype(dtype))
    w = w.at[2 * dim:, :].add(-v_low.astype(dtype))

    b_q = (U_q_r * jnp.sqrt(S_q_r)[None, :]).astype(dtype)   # (dim, r)
    a_q = (jnp.sqrt(S_q_r)[:, None] * Vh_q_r).astype(dtype)  # (r, D)
    b_v = (U_v_r * jnp.sqrt(S_v_r)[None, :]).astype(dtype)
    a_v = (jnp.sqrt(S_v_r)[:, None] * Vh_v_r).astype(dtype)

    scaling = lora_alpha / lora_r
    return dict(w_qkv=w, b_qkv=b, a_q=a_q, b_q=b_q, a_v=a_v, b_v=b_v,
                scaling=scaling, dim=dim)


def pissa_reference(x, p):
    qkv = x @ p["w_qkv"].T + p["b_qkv"]
    dim = p["dim"]
    lora_q = ((x @ p["a_q"].T) @ p["b_q"].T) * p["scaling"]
    lora_v = ((x @ p["a_v"].T) @ p["b_v"].T) * p["scaling"]
    q = qkv[..., :dim] + lora_q
    k = qkv[..., dim:2 * dim]
    v = qkv[..., 2 * dim:] + lora_v
    return jnp.concatenate([q, k, v], axis=-1)


if __name__ == "__main__":
    key = jax.random.PRNGKey(0)
    kx, kp, kx2, kp2 = jax.random.split(key, 4)

    # --- Test 1: small shapes, f32, default (large-tile) config. --------------
    B, S, D = 2, 8, 32      # batch, seq, in_features (hidden)
    lora_r, lora_alpha = 4, 1.0

    params = make_pissa_params(kp, D, lora_r, lora_alpha, dtype=jnp.float32)
    x = jax.random.normal(kx, (B, S, D), dtype=jnp.float32)

    packed = prepare_pissa_weights(
        params["w_qkv"], params["b_qkv"],
        params["a_q"], params["b_q"], params["a_v"], params["b_v"],
        scaling=params["scaling"])

    out = jax.block_until_ready(pissa_forward(x, packed))
    ref = pissa_reference(x, params)
    assert out.shape == (B, S, 3 * D)
    assert jnp.allclose(out, ref, atol=1e-4, rtol=1e-4)

    # --- Test 2: multi-tile grid (ni=2, nj>1, nk>1) exercising the k-sweep ----
    # accumulation and the j>0 reuse of the LoRA accumulator.
    D2 = 256
    params2 = make_pissa_params(kp2, D2, lora_r, lora_alpha, dtype=jnp.float32)
    x2 = jax.random.normal(kx2, (3, 8, D2), dtype=jnp.float32)
    packed2 = prepare_pissa_weights(
        params2["w_qkv"], params2["b_qkv"],
        params2["a_q"], params2["b_q"], params2["a_v"], params2["b_v"],
        scaling=params2["scaling"], tn_target=128, tk_target=128)
    out2 = jax.block_until_ready(pissa_forward(x2, packed2, tm_target=16))
    ref2 = pissa_reference(x2, params2)
    assert out2.shape == (3, 8, 3 * D2)
    assert jnp.allclose(out2, ref2, atol=1e-3, rtol=1e-3)

    # --- Test 3: bf16 weights + bf16 activations (memory-bound fast path). ----
    packed_bf16 = prepare_pissa_weights(
        params["w_qkv"], params["b_qkv"],
        params["a_q"], params["b_q"], params["a_v"], params["b_v"],
        scaling=params["scaling"], weight_dtype=jnp.bfloat16)
    out_bf16 = jax.block_until_ready(
        pissa_forward(x.astype(jnp.bfloat16), packed_bf16))
    assert out_bf16.shape == (B, S, 3 * D)
    assert jnp.allclose(out_bf16.astype(jnp.float32), ref, atol=8e-2, rtol=8e-2)

    print("KERNEL_OK")
</pallas_src>

<mosaic_0001>
module attributes {stable_mosaic.version = 11 : i64} {
  func.func @_pissa_kernel(%arg0: i32, %arg1: i32, %arg2: i32, %arg3: memref<8x128xf32, #tpu.memory_space<vmem>>, %arg4: memref<128x128xf32, #tpu.memory_space<vmem>>, %arg5: memref<1x128xf32, #tpu.memory_space<vmem>>, %arg6: memref<128x128xf32, #tpu.memory_space<vmem>>, %arg7: memref<128x128xf32, #tpu.memory_space<vmem>>, %arg8: memref<8x128xf32, #tpu.memory_space<vmem>>, %arg9: memref<8x128xf32, #tpu.memory_space<vmem>>, %arg10: memref<8x128xf32, #tpu.memory_space<vmem>>) attributes {dimension_semantics = [#tpu.dimension_semantics<parallel>, #tpu.dimension_semantics<arbitrary>, #tpu.dimension_semantics<arbitrary>], iteration_bounds = array<i64: 2, 1, 1>, scalar_prefetch = 0 : i64, scratch_operands = 2 : i64, tpu.core_type = #tpu.core_type<tc>, window_params = [{transform_indices = @transform_0, window_bounds = array<i64: 8, 128>}, {transform_indices = @transform_1, window_bounds = array<i64: 128, 128>}, {transform_indices = @transform_2, window_bounds = array<i64: 1, 128>}, {transform_indices = @transform_3, window_bounds = array<i64: 128, 128>}, {transform_indices = @transform_4, window_bounds = array<i64: 128, 128>}, {transform_indices = @transform_5, window_bounds = array<i64: 8, 128>}]} {
    %c0_i32 = arith.constant 0 : i32
    %0 = arith.cmpi eq, %arg2, %c0_i32 : i32
    %1 = arith.extui %0 : i1 to i32
    %c0_i32_0 = arith.constant 0 : i32
    %2 = arith.cmpi ne, %1, %c0_i32_0 : i32
    scf.if %2 {
      %c0_18 = arith.constant 0 : index
      %c0_19 = arith.constant 0 : index
      %32 = vector.load %arg5[%c0_18, %c0_19] : memref<1x128xf32, #tpu.memory_space<vmem>>, vector<1x128xf32>
      %33 = vector.shape_cast %32 : vector<1x128xf32> to vector<1x128xf32>
      %34 = vector.broadcast %33 : vector<1x128xf32> to vector<8x128xf32>
      %c0_20 = arith.constant 0 : index
      %c0_21 = arith.constant 0 : index
      %35 = vector.load %arg9[%c0_20, %c0_21] : memref<8x128xf32, #tpu.memory_space<vmem>>, vector<8x128xf32>
      tpu.vector_store %arg9[%c0_20, %c0_21], %34 {strides = array<i32>} : memref<8x128xf32, #tpu.memory_space<vmem>>, vector<8x128xf32>,
    } else {
    }
    %c0_i32_1 = arith.constant 0 : i32
    %3 = arith.cmpi eq, %arg1, %c0_i32_1 : i32
    %c0_i32_2 = arith.constant 0 : i32
    %4 = arith.cmpi eq, %arg2, %c0_i32_2 : i32
    %5 = arith.andi %3, %4 : i1
    %6 = arith.extui %5 : i1 to i32
    %c0_i32_3 = arith.constant 0 : i32
    %7 = arith.cmpi ne, %6, %c0_i32_3 : i32
    scf.if %7 {
      %cst_18 = arith.constant 0.000000e+00 : f32
      %32 = vector.broadcast %cst_18 : f32 to vector<8x128xf32>
      %c0_19 = arith.constant 0 : index
      %c0_20 = arith.constant 0 : index
      %33 = vector.load %arg10[%c0_19, %c0_20] : memref<8x128xf32, #tpu.memory_space<vmem>>, vector<8x128xf32>
      tpu.vector_store %arg10[%c0_19, %c0_20], %32 {strides = array<i32>} : memref<8x128xf32, #tpu.memory_space<vmem>>, vector<8x128xf32>,
    } else {
    }
    %c0 = arith.constant 0 : index
    %c0_4 = arith.constant 0 : index
    %8 = vector.load %arg3[%c0, %c0_4] : memref<8x128xf32, #tpu.memory_space<vmem>>, vector<8x128xf32>
    %c0_5 = arith.constant 0 : index
    %c0_6 = arith.constant 0 : index
    %9 = vector.load %arg9[%c0_5, %c0_6] : memref<8x128xf32, #tpu.memory_space<vmem>>, vector<8x128xf32>
    %c0_7 = arith.constant 0 : index
    %c0_8 = arith.constant 0 : index
    %10 = vector.load %arg4[%c0_7, %c0_8] : memref<128x128xf32, #tpu.memory_space<vmem>>, vector<128x128xf32>
    %cst = arith.constant dense<0.000000e+00> : vector<8x128xf32>
    %11 = tpu.matmul %8, %10, %cst {dimension_numbers = #tpu.dot_dimension_numbers<[1], [0], [0], [1], [0, 0, 1, 1], [], []>} : vector<8x128xf32>, vector<128x128xf32>, vector<8x128xf32> -> vector<8x128xf32>
    %12 = arith.addf %9, %11 : vector<8x128xf32>
    %c0_9 = arith.constant 0 : index
    %c0_10 = arith.constant 0 : index
    %13 = vector.load %arg9[%c0_9, %c0_10] : memref<8x128xf32, #tpu.memory_space<vmem>>, vector<8x128xf32>
    tpu.vector_store %arg9[%c0_9, %c0_10], %12 {strides = array<i32>} : memref<8x128xf32, #tpu.memory_space<vmem>>, vector<8x128xf32>,
    %c0_i32_11 = arith.constant 0 : i32
    %14 = arith.cmpi eq, %arg1, %c0_i32_11 : i32
    %15 = arith.extui %14 : i1 to i32
    %c0_i32_12 = arith.constant 0 : i32
    %16 = arith.cmpi ne, %15, %c0_i32_12 : i32
    scf.if %16 {
      %c0_18 = arith.constant 0 : index
      %c0_19 = arith.constant 0 : index
      %32 = vector.load %arg10[%c0_18, %c0_19] : memref<8x128xf32, #tpu.memory_space<vmem>>, vector<8x128xf32>
      %c0_20 = arith.constant 0 : index
      %c0_21 = arith.constant 0 : index
      %33 = vector.load %arg6[%c0_20, %c0_21] : memref<128x128xf32, #tpu.memory_space<vmem>>, vector<128x128xf32>
      %cst_22 = arith.constant dense<0.000000e+00> : vector<8x128xf32>
      %34 = tpu.matmul %8, %33, %cst_22 {dimension_numbers = #tpu.dot_dimension_numbers<[1], [0], [0], [1], [0, 0, 1, 1], [], []>} : vector<8x128xf32>, vector<128x128xf32>, vector<8x128xf32> -> vector<8x128xf32>
      %35 = arith.addf %32, %34 : vector<8x128xf32>
      %c0_23 = arith.constant 0 : index
      %c0_24 = arith.constant 0 : index
      %36 = vector.load %arg10[%c0_23, %c0_24] : memref<8x128xf32, #tpu.memory_space<vmem>>, vector<8x128xf32>
      tpu.vector_store %arg10[%c0_23, %c0_24], %35 {strides = array<i32>} : memref<8x128xf32, #tpu.memory_space<vmem>>, vector<8x128xf32>,
    } else {
    }
    %c128_i32 = arith.constant 128 : i32
    %17 = arith.muli %arg1, %c128_i32 : i32
    %c32_i32 = arith.constant 32 : i32
    %18 = arith.cmpi sge, %17, %c32_i32 : i32
    %c1_i32 = arith.constant 1 : i32
    %19 = arith.addi %arg1, %c1_i32 : i32
    %c128_i32_13 = arith.constant 128 : i32
    %20 = arith.muli %19, %c128_i32_13 : i32
    %c64_i32 = arith.constant 64 : i32
    %21 = arith.cmpi sle, %20, %c64_i32 : i32
    %22 = arith.andi %18, %21 : i1
    %c0_i32_14 = arith.constant 0 : i32
    %23 = arith.cmpi eq, %arg2, %c0_i32_14 : i32
    %true = arith.constant true
    %24 = arith.xori %22, %true : i1
    %25 = arith.andi %23, %24 : i1
    %26 = arith.extui %25 : i1 to i32
    %c0_i32_15 = arith.constant 0 : i32
    %27 = arith.cmpi ne, %26, %c0_i32_15 : i32
    scf.if %27 {
      %c0_18 = arith.constant 0 : index
      %c0_19 = arith.constant 0 : index
      %32 = vector.load %arg10[%c0_18, %c0_19] : memref<8x128xf32, #tpu.memory_space<vmem>>, vector<8x128xf32>
      %c0_20 = arith.constant 0 : index
      %c0_21 = arith.constant 0 : index
      %33 = vector.load %arg7[%c0_20, %c0_21] : memref<128x128xf32, #tpu.memory_space<vmem>>, vector<128x128xf32>
      %cst_22 = arith.constant dense<0.000000e+00> : vector<8x128xf32>
      %34 = tpu.matmul %32, %33, %cst_22 {dimension_numbers = #tpu.dot_dimension_numbers<[1], [0], [0], [1], [0, 0, 1, 1], [], []>} : vector<8x128xf32>, vector<128x128xf32>, vector<8x128xf32> -> vector<8x128xf32>
      %c0_23 = arith.constant 0 : index
      %c0_24 = arith.constant 0 : index
      %35 = vector.load %arg9[%c0_23, %c0_24] : memref<8x128xf32, #tpu.memory_space<vmem>>, vector<8x128xf32>
      %36 = arith.addf %35, %34 : vector<8x128xf32>
      %c0_25 = arith.constant 0 : index
      %c0_26 = arith.constant 0 : index
      %37 = vector.load %arg8[%c0_25, %c0_26] : memref<8x128xf32, #tpu.memory_space<vmem>>, vector<8x128xf32>
      tpu.vector_store %arg8[%c0_25, %c0_26], %36 {strides = array<i32>} : memref<8x128xf32, #tpu.memory_space<vmem>>, vector<8x128xf32>,
    } else {
    }
    %c0_i32_16 = arith.constant 0 : i32
    %28 = arith.cmpi eq, %arg2, %c0_i32_16 : i32
    %29 = arith.andi %28, %22 : i1
    %30 = arith.extui %29 : i1 to i32
    %c0_i32_17 = arith.constant 0 : i32
    %31 = arith.cmpi ne, %30, %c0_i32_17 : i32
    scf.if %31 {
      %c0_18 = arith.constant 0 : index
      %c0_19 = arith.constant 0 : index
      %32 = vector.load %arg9[%c0_18, %c0_19] : memref<8x128xf32, #tpu.memory_space<vmem>>, vector<8x128xf32>
      %c0_20 = arith.constant 0 : index
      %c0_21 = arith.constant 0 : index
      %33 = vector.load %arg8[%c0_20, %c0_21] : memref<8x128xf32, #tpu.memory_space<vmem>>, vector<8x128xf32>
      tpu.vector_store %arg8[%c0_20, %c0_21], %32 {strides = array<i32>} : memref<8x128xf32, #tpu.memory_space<vmem>>, vector<8x128xf32>,
    } else {
    }
    return
  }
  func.func @transform_0(%arg0: i32, %arg1: i32, %arg2: i32) -> (i32, i32) {
    %c0_i32 = arith.constant 0 : i32
    return %arg0, %arg2 : i32, i32
  }
  func.func @transform_1(%arg0: i32, %arg1: i32, %arg2: i32) -> (i32, i32) {
    %c0_i32 = arith.constant 0 : i32
    return %arg2, %arg1 : i32, i32
  }
  func.func @transform_2(%arg0: i32, %arg1: i32, %arg2: i32) -> (i32, i32) {
    %c0_i32 = arith.constant 0 : i32
    %c0_i32_0 = arith.constant 0 : i32
    return %c0_i32, %arg1 : i32, i32
  }
  func.func @transform_3(%arg0: i32, %arg1: i32, %arg2: i32) -> (i32, i32) {
    %c0_i32 = arith.constant 0 : i32
    %0 = arith.cmpi eq, %arg1, %c0_i32 : i32
    %c0_i32_0 = arith.constant 0 : i32
    %1 = arith.select %0, %arg2, %c0_i32_0 : i32
    %c0_i32_1 = arith.constant 0 : i32
    %c0_i32_2 = arith.constant 0 : i32
    return %1, %c0_i32_1 : i32, i32
  }
  func.func @transform_4(%arg0: i32, %arg1: i32, %arg2: i32) -> (i32, i32) {
    %c0_i32 = arith.constant 0 : i32
    %c0_i32_0 = arith.constant 0 : i32
    return %c0_i32, %arg1 : i32, i32
  }
  func.func @transform_5(%arg0: i32, %arg1: i32, %arg2: i32) -> (i32, i32) {
    %c0_i32 = arith.constant 0 : i32
    return %arg0, %arg1 : i32, i32
  }
}

</mosaic_0001>

<bundles_post_ra>
// kernel: tpu_custom_call.1
= control target key start
LH: loop header
LB: loop body
LE: loop exit
PB: predicated region body
PF: predicated region fallthrough
CT: control target
= control target key end

     0   :  { %10 = vsyncpa [#allocation5], 0  ;;  %s1733_s0 = inlined_call_operand.hbm [shape: f32[16,128], index: 0, kind: input, shape index: {}]   ;;  %s1734_s1 = inlined_call_operand.hbm [shape: f32[128,128], index: 1, kind: input, shape index: {}]   ;;  %s1735_s2 = inlined_call_operand.vmem [shape: f32[1,128], index: 2, kind: input, shape index: {}]   ;;  %s1736_s3 = inlined_call_operand.hbm [shape: f32[128,128], index: 3, kind: input, shape index: {}]   ;;  %s1737_s4 = inlined_call_operand.hbm [shape: f32[128,128], index: 4, kind: input, shape index: {}]   ;;  %s1738_s5 = inlined_call_operand.hbm [shape: f32[16,128], index: 5, kind: output, shape index: {}]  }
   0x1   :  { %12 = vsyncpa [#allocation5 + $0x1], 0 }
   0x2   :  { %13 = vsyncpa [#allocation8], 0 }
   0x3   :  { %14 = vsyncpa [#allocation11], 0 }
   0x4   :  { %15 = vsyncpa [#allocation6], 0 }
   0x5   :  { %17 = vsyncpa [#allocation6 + $0x1], 0  ;;  %s1409_s18 = smov 0   ;;  %s1411_s19 = smov 0  }
   0x6   :  { %s1413_s20 = smov 0   ;;  %s1415_s21 = smov 0  }
   0x7   :  { %s1417_s22 = smov 0   ;;  %s1419_s23 = smov 0  }
   0x8 LB: > { %1745 = sst [smem:[#allocation17_spill]] %s1347_s18  ;;  %s813_s24 = sadd.s32 4294967295, %s1367_s23   ;;  %s1367_s23 = sphi %s1419_s23, %s23_s23   ;;  %s1363_s22 = sphi %s1417_s22, %s1768_s22   ;;  %s1359_s21 = sphi %s1415_s21, %s1767_s21   ;;  %s1355_s20 = sphi %s1413_s20, %s1766_s20   ;;  %s1351_s19 = sphi %s1411_s19, %s1765_s19   ;;  %s1347_s18 = sphi %s1409_s18, %s1764_s18  }
   0x9   : > { %s814_s25 = sadd.s32 4294967294, %s1367_s23   ;;  %p64_p0 = scmp.ne.s32.totalorder %s1351_s19, %s1347_s18 }
   0xa   : > { %p1443_p1 = scmp.eq.s32.totalorder %s813_s24, 0  ;;  %p1447_p2 = scmp.eq.s32.totalorder %s813_s24, 1 }
   0xb   : > { %p206_p3 = scmp.eq.s32.totalorder %s814_s25, 1  ;;  %p815_p5 = scmp.ge.s32.totalorder %s1367_s23, 1 }
   0xc   : > { %s1746_s26 = scalar_select %p1443_p1, 1, 0 }
   0xd   : > { %s1747_s27 = scalar_select %p1447_p2, 1, 0 }
   0xe   : > { %p1453_p4 = por %p1443_p1, %p64_p0  ;;  %p1458_p6 = por %p206_p3, %p64_p0 }
   0xf   : > { %p213_p7 = scmp.lt.s32.totalorder %s1367_s23, 3  ;;  %s1369_s6 = smov [#allocation7]  }
  0x10   : > { %s1748_s28 = scalar_select %p1453_p4, 1, 0 }
  0x11   : > { %s1749_s29 = scalar_select %p1458_p6, 1, 0 }
  0x12   : > { %p1463_p8 = pnand %p815_p5, %p213_p7  ;;  %s229_s7 = sshll.u32 %s1369_s6, 4  ;;  %s1467_s7 = int_to_ptr.vmem [resolvable:$true] %s229_s7 }
  0x13   : > { %1750 = sst [smem:[#allocation18_spill]] %s1749_s29  ;;  %s1370_s9 = smov [#allocation9]  }
  0x14   : > { %s1751_s30 = scalar_select %p1463_p8, 1, 0 }
  0x15   : > { %p1081_p9 = pneg %p1463_p8  ;;  %s253_s10 = sshll.u32 %s1370_s9, 4  ;;  %s1478_s10 = int_to_ptr.vmem [resolvable:$true] %s253_s10 }
  0x16   : > { %s1371_s11 = smov [#allocation10]   ;;  %s1163_s15 = scalar_lea.hbm %s1734_s1, 2048 }
  0x17   : > { %p1474_p11 = pnand %p1081_p9, %p1443_p1  ;;  %s1480_s12 = sshll.u32 %s1371_s11, 4  ;;  %s269_s12 = int_to_ptr.vmem [resolvable:$true] %s1480_s12 }
  0x18   : > { %p1164_p12 = scmp.ne.s32.totalorder %s1734_s1, %s1163_s15  ;;  %p1170_p5 = scmp.lt.u32.totalorder %s1163_s15, %s1734_s1 }
  0x19   : > { %p1490_p13 = pneg %p1474_p11 }
  0x1b   : > { %p1166_p0 = pnand %p1490_p13, %p1164_p12 }
  0x1d   : > { %p1167_p3 = pneg %p1166_p0 }
  0x1f   : > { %p1172_p7 = pnand %p1170_p5, %p1167_p3 }
  0x21   : > { %1175 = shalt.err (!%p1172_p7)
}
  0x22   : > { %s1176_s9 = scalar_lea.vmem %s1467_s7, 2048  ;;  %p1184_p1 = scmp.lt.s32.totalorder %s1467_s7, %s1467_s7 }
  0x23   : > { %p1177_p9 = scmp.ne.s32.totalorder %s1467_s7, %s1176_s9  ;;  %p1185_p4 = scmp.lt.s32.totalorder %s1176_s9, %s1176_s9 }
  0x25   : > { %p1179_p10 = pnand %p1177_p9, %p1490_p13  ;;  %p1186_p12 = por %p1185_p4, %p1184_p1 }
  0x27   : > { %p1180_p6 = pneg %p1179_p10 }
  0x29   : > { %p1187_p0 = pnand %p1186_p12, %p1180_p6 }
  0x2b   : > { %1190 = shalt.err (!%p1187_p0)
}
  0x2c   : > { %s1372_s11 = smov 128   ;;  %s1373_s13 = smov 8  }
  0x2d   : > { %1084 = dma.hbm_to_vmem [thread:$0]  (!%p1474_p11), %s1734_s1, 2048, %s1467_s7, [#allocation8], %s1372_s11, %s1372_s11, %s1373_s13  }
  0x2e   : > { %s1191_s25 = scalar_lea.hbm %s1736_s3, 2048 }
  0x2f   : > { %p1192_p1 = scmp.ne.s32.totalorder %s1736_s3, %s1191_s25  ;;  %p1198_p10 = scmp.lt.u32.totalorder %s1191_s25, %s1736_s3 }
  0x31   : > { %p1194_p4 = pnand %p1192_p1, %p1490_p13 }
  0x33   : > { %p1195_p6 = pneg %p1194_p4 }
  0x35   : > { %p1200_p3 = pnand %p1198_p10, %p1195_p6 }
  0x37   : > { %1203 = shalt.err (!%p1200_p3)
}
  0x38   : > { %s1204_s7 = scalar_lea.vmem %s1478_s10, 2048  ;;  %p1212_p12 = scmp.lt.s32.totalorder %s1478_s10, %s1478_s10 }
  0x39   : > { %p1205_p5 = scmp.ne.s32.totalorder %s1478_s10, %s1204_s7  ;;  %p1213_p0 = scmp.lt.s32.totalorder %s1204_s7, %s1204_s7 }
  0x3b   : > { %p1207_p7 = pnand %p1205_p5, %p1490_p13  ;;  %p1214_p1 = por %p1213_p0, %p1212_p12 }
  0x3d   : > { %p1208_p9 = pneg %p1207_p7 }
  0x3f   : > { %p1215_p4 = pnand %p1214_p1, %p1208_p9 }
  0x41   : > { %1218 = shalt.err (!%p1215_p4)
}
  0x42   : > { %1087 = dma.hbm_to_vmem [thread:$0]  (!%p1474_p11), %s1736_s3, 2048, %s1478_s10, [#allocation8], %s1372_s11, %s1372_s11, %s1373_s13  }
  0x43   : > { %s1219_s16 = scalar_lea.hbm %s1737_s4, 2048 }
  0x44   : > { %p1220_p6 = scmp.ne.s32.totalorder %s1737_s4, %s1219_s16  ;;  %p1226_p5 = scmp.lt.u32.totalorder %s1219_s16, %s1737_s4 }
  0x46   : > { %p1222_p10 = pnand %p1220_p6, %p1490_p13 }
  0x48   : > { %p1223_p3 = pneg %p1222_p10 }
  0x4a   : > { %p1228_p7 = pnand %p1226_p5, %p1223_p3 }
  0x4c   : > { %1231 = shalt.err (!%p1228_p7)
}
  0x4d   : > { %s1232_s7 = scalar_lea.vmem %s269_s12, 2048  ;;  %p1240_p1 = scmp.lt.s32.totalorder %s269_s12, %s269_s12 }
  0x4e   : > { %p1233_p9 = scmp.ne.s32.totalorder %s269_s12, %s1232_s7  ;;  %p1241_p4 = scmp.lt.s32.totalorder %s1232_s7, %s1232_s7 }
  0x50   : > { %p1235_p12 = pnand %p1233_p9, %p1490_p13  ;;  %p1242_p8 = por %p1241_p4, %p1240_p1 }
  0x52   : > { %p1236_p0 = pneg %p1235_p12 }
  0x54   : > { %p1243_p2 = pnand %p1242_p8, %p1236_p0 }
  0x56   : > { %1246 = shalt.err (!%p1243_p2)
}
  0x57   : > { %1090 = dma.hbm_to_vmem [thread:$0]  (!%p1474_p11), %s1737_s4, 2048, %s269_s12, [#allocation11], %s1372_s11, %s1372_s11, %s1373_s13  }
  0x58   : > { %s51_s24 = sadd.s32 1, %s1355_s20  ;;  %s42_s8 = sadd.s32 1, %s1363_s22 }
  0x59   : > { %p58_p2 = scmp.ne.s32.totalorder %s1355_s20, %s1351_s19  ;;  %p44_p8 = scmp.ge.s32.totalorder %s42_s8, 2 }
  0x5a   : > { %p59_p13 = scmp.eq.s32.totalorder %s1367_s23, 0  ;;  %p1754_p6 = scmp.ne.s32.totalorder %s1747_s27, 0 }
  0x5b   : > { %p1102_p3 = scmp.lt.s32.totalorder %s1367_s23, 2  ;;  %s1770_s8 = smov (%p44_p8, %s42_s8), 0 }
  0x5c   : > { %p1569_p10 = por %p1754_p6, %p58_p2  ;;  %p60_p5 = por %p59_p13, %p58_p2 }
  0x5d   : > { %s282_s14 = sand.u32 1, %s1355_s20   ;;  %s46_s15 = ssub.s32 %s1363_s22, %s1770_s8 }
  0x5e   : > { %p49_p7 = scmp.eq.s32.totalorder %s46_s15, 0  ;;  %s821_s12 = sshll.u32 %s282_s14, 3 }
  0x5f   : > { %s822_s11 = sshll.u32 %s1363_s22, 7  ;;  %s286_s25 = scalar_lea.vmem [#allocation4], %s821_s12 }
  0x60   : > { %s1581_s13 = scalar_select %p49_p7, %s1355_s20, %s51_s24  }
  0x61   : > { %s1586_s27 = scalar_lea.hbm %s1733_s0, %s822_s11  ;;  %s294_s6 = sshll.u32 %s286_s25, 4  ;;  %s1588_s6 = int_to_ptr.vmem [resolvable:$true] %s294_s6 }
  0x62   : > { %p1592_p11 = pnand %p1102_p3, %p60_p5  ;;  %s283_s7 = scalar_lea.sflag [#allocation5], %s282_s14 }
  0x63   : > { %s1247_s10 = scalar_lea.hbm %s1586_s27, 128  ;;  %s1252_s15 = scalar_lea.hbm %s1733_s0, 256 }
  0x64   : > { %p1248_p9 = scmp.ne.s32.totalorder %s1586_s27, %s1247_s10  ;;  %p1249_p12 = pneg %p1592_p11 }
  0x65   : > { %p1253_p4 = scmp.lt.u32.totalorder %s1586_s27, %s1733_s0  ;;  %p1254_p2 = scmp.lt.u32.totalorder %s1252_s15, %s1247_s10 }
  0x66   : > { %p1250_p0 = pnand %p1249_p12, %p1248_p9  ;;  %p1256_p13 = scmp.lt.u32.totalorder %s1247_s10, %s1586_s27 }
  0x67   : > { %p1255_p8 = por %p1254_p2, %p1253_p4 }
  0x68   : > { %p1251_p1 = pneg %p1250_p0 }
  0x69   : > { %p1257_p6 = por %p1256_p13, %p1255_p8 }
  0x6b   : > { %p1258_p3 = pnand %p1257_p6, %p1251_p1 }
  0x6d   : > { %1261 = shalt.err (!%p1258_p3)
}
  0x6e   : > { %s1262_s14 = scalar_lea.vmem %s1588_s6, 128  ;;  %s1374_s16 = smov [#allocation4]  }
  0x6f   : > { %p1263_p5 = scmp.ne.s32.totalorder %s1588_s6, %s1262_s14  ;;  %s1267_s17 = sshll.u32 %s1374_s16, 4  ;;  %s1268_s17 = int_to_ptr.vmem [resolvable:$false] %s1267_s17 }
  0x70   : > { %s1269_s25 = scalar_lea.vmem %s1268_s17, 256  ;;  %p1270_p0 = scmp.lt.s32.totalorder %s1588_s6, %s1268_s17 }
  0x71   : > { %p1265_p7 = pnand %p1263_p5, %p1249_p12  ;;  %p1271_p4 = scmp.lt.s32.totalorder %s1269_s25, %s1262_s14 }
  0x73   : > { %p1266_p9 = pneg %p1265_p7  ;;  %p1272_p2 = por %p1271_p4, %p1270_p0 }
  0x75   : > { %p1273_p8 = pnand %p1272_p2, %p1266_p9 }
  0x77   : > { %1276 = shalt.err (!%p1273_p8)
}
  0x78   : > { %1094 = dma.hbm_to_vmem [thread:$0]  (!%p1592_p11), %s1586_s27, 128, %s1588_s6, %s283_s7  }
  0x79   : > { %p1757_p1 = scmp.ne.s32.totalorder %s1751_s30, 0 }
  0x7a   : > { %s1624_s10 = sand.u32 (!%p1757_p1), 1, %s1351_s19   ;;  %p1758_p12 = scmp.ne.s32.totalorder (!%p1757_p1), %s1748_s28, 0 }
  0x7b   : > { %303 = sbr.rel (%p1757_p1) target bundleno = 611 (0x263), region = 40  ;;  %s824_s18 = sshll.u32 (!%p1757_p1), %s1624_s10, 3 }
  0x7c   : > { %s306_s24 = scalar_lea.sflag (!%p1757_p1), [#allocation5], %s1624_s10  ;;  %s1630_s15 = scalar_lea.vmem (!%p1757_p1), [#allocation4], %s824_s18 }
  0x82   : > { %1330 = dma.done.wait (%p1758_p12), %s306_s24, 128  }
  0x83   : > { %1332 = vsyncadd (%p1758_p12), %s306_s24, 4294967168  ;;  %p1759_p11 = scmp.ne.s32.totalorder %s1746_s26, 0 }
  0x85   : > { %1334 = dma.done.wait (%p1759_p11), [#allocation8], 4096  }
  0x86   : > { %1336 = vsyncadd (%p1759_p11), [#allocation8], 4294963200 }
  0x87   : > { %1338 = dma.done.wait (%p1759_p11), [#allocation11], 2048  }
  0x88   : > { %1340 = vsyncadd (%p1759_p11), [#allocation11], 4294965248  ;;  %v1375_v0 = vmov 0.0|0.0   ;;  %vm1376_vm0 = vmmov 0   ;;  %v1377_v1 = vmov 0.0   ;;  %v470_v2 = vld [vmem:[#allocation9] sm:$0xff] }
  0x89   : > { %1014 = vmatprep.subr.bf16.mxu1 %v1375_v0  ;;  %952 = vmatprep.mubr.msk.f32.mxu1 %vm1376_vm0, %v1377_v1  ;;  %v471_v3 = vld [vmem:[#allocation9 + $0x8] sm:$0xff]  ;;  %v472_v4 = vld [vmem:[#allocation9 + $0x10] sm:$0xff]  ;;  %v473_v6 = vld [vmem:[#allocation9 + $0x18] sm:$0xff]  ;;  %s831_s30 = sshll.u32 %s1359_s21, 7  ;;  %s350_s27 = scalar_lea.vmem [#allocation12], %s824_s18 }
  0x8a   : > { %990 = vmatprep.subr.bf16.mxu0 %v1375_v0  ;;  %917 = vmatprep.mubr.msk.f32.mxu0 %vm1376_vm0, %v1377_v1  ;;  %v1015_v5 = vpack.c.bf16 %v471_v3, %v470_v2  ;;  %v1018_v7 = vpack.c.bf16 %v473_v6, %v472_v4  ;;  %v474_v8 = vld [vmem:[#allocation9 + $0x20] sm:$0xff]  ;;  %v475_v9 = vld [vmem:[#allocation9 + $0x28] sm:$0xff]  ;;  %v380_v12 = vld [vmem:[#allocation7 + $0x10] sm:$0xff]  ;;  %s681_s6 = sshll.u32 %s350_s27, 4  ;;  %s1684_s12 = scalar_lea.hbm %s1738_s5, %s831_s30  ;;  %s1686_s6 = int_to_ptr.vmem [resolvable:$true] %s681_s6 }
  0x8b   : > { %v378_v10 = vld [vmem:[#allocation7] sm:$0xff]  ;;  %v379_v11 = vld [vmem:[#allocation7 + $0x8] sm:$0xff]  ;;  %v381_v13 = vld [vmem:[#allocation7 + $0x18] sm:$0xff]  ;;  %v1021_v14 = vpack.c.bf16 %v475_v9, %v474_v8  ;;  %s667_s11 = scalar_lea.sflag [#allocation6], %s1624_s10  ;;  %s1277_s14 = scalar_lea.vmem %s1686_s6, 128 }
  0x8c   : > { %1016 = vmatpush3.bf16.msra.mxu1 %v1015_v5  ;;  %v991_v15 = vpack.c.bf16 %v379_v11, %v378_v10  ;;  %v476_v16 = vld [vmem:[#allocation9 + $0x30] sm:$0xff]  ;;  %v477_v17 = vld [vmem:[#allocation9 + $0x38] sm:$0xff]  ;;  %v994_v18 = vpack.c.bf16 %v381_v13, %v380_v12  ;;  %v382_v19 = vld [vmem:[#allocation7 + $0x20] sm:$0xff]  ;;  %p1278_p13 = scmp.ne.s32.totalorder %s1686_s6, %s1277_s14  ;;  %s1378_s21 = smov [#allocation12]  }
  0x8d   : > { %1017 = vmatprep.subr.bf16.mxu1 %v1375_v0  ;;  %v383_v20 = vld [vmem:[#allocation7 + $0x28] sm:$0xff]  ;;  %v1024_v21 = vpack.c.bf16 %v477_v17, %v476_v16  ;;  %v478_v22 = vld [vmem:[#allocation9 + $0x40] sm:$0xff]  ;;  %v384_v25 = vld [vmem:[#allocation7 + $0x30] sm:$0xff]  ;;  %s1281_s16 = sshll.u32 %s1378_s21, 4  ;;  %s1282_s16 = int_to_ptr.vmem [resolvable:$false] %s1281_s16 }
  0x8e   : > { %992 = vmatpush3.bf16.msra.mxu0 %v991_v15  ;;  %v479_v23 = vld [vmem:[#allocation9 + $0x48] sm:$0xff]  ;;  %v997_v24 = vpack.c.bf16 %v383_v20, %v382_v19  ;;  %v385_v26 = vld [vmem:[#allocation7 + $0x38] sm:$0xff]  ;;  %v480_v28 = vld [vmem:[#allocation9 + $0x50] sm:$0xff]  ;;  %p1279_p6 = pnand %p1278_p13, %p1569_p10  ;;  %s1283_s17 = scalar_lea.vmem %s1282_s16, 256 }
  0x8f   : > { %993 = vmatprep.subr.bf16.mxu0 %v1375_v0  ;;  %v1027_v27 = vpack.c.bf16 %v479_v23, %v478_v22  ;;  %v481_v29 = vld [vmem:[#allocation9 + $0x58] sm:$0xff]  ;;  %v1000_v30 = vpack.c.bf16 %v385_v26, %v384_v25  ;;  %v386_v31 = vld [vmem:[#allocation7 + $0x40] sm:$0xff]  ;;  %v387_v32 = vld [vmem:[#allocation7 + $0x48] sm:$0xff]  ;;  %p1284_p5 = scmp.lt.s32.totalorder %s1686_s6, %s1282_s16  ;;  %p1285_p7 = scmp.lt.s32.totalorder %s1283_s17, %s1277_s14 }
  0x90   : > { %1019 = vmatpush3.bf16.msra.mxu1 %v1018_v7  ;;  %v1030_v33 = vpack.c.bf16 %v481_v29, %v480_v28  ;;  %v482_v34 = vld [vmem:[#allocation9 + $0x60] sm:$0xff]  ;;  %v483_v35 = vld [vmem:[#allocation9 + $0x68] sm:$0xff]  ;;  %v1003_v36 = vpack.c.bf16 %v387_v32, %v386_v31  ;;  %v388_v37 = vld [vmem:[#allocation7 + $0x50] sm:$0xff]  ;;  %p1280_p3 = pneg %p1279_p6 }
  0x91   : > { %1020 = vmatprep.subr.bf16.mxu1 %v1375_v0  ;;  %v389_v38 = vld [vmem:[#allocation7 + $0x58] sm:$0xff]  ;;  %v1033_v39 = vpack.c.bf16 %v483_v35, %v482_v34  ;;  %v484_v40 = vld [vmem:[#allocation9 + $0x70] sm:$0xff]  ;;  %v390_v43 = vld [vmem:[#allocation7 + $0x60] sm:$0xff]  ;;  %p1286_p9 = por %p1285_p7, %p1284_p5 }
  0x92   : > { %995 = vmatpush3.bf16.msra.mxu0 %v994_v18  ;;  %v485_v41 = vld [vmem:[#allocation9 + $0x78] sm:$0xff]  ;;  %v1006_v42 = vpack.c.bf16 %v389_v38, %v388_v37  ;;  %v391_v44 = vld [vmem:[#allocation7 + $0x68] sm:$0xff]  ;;  %v392_v47 = vld [vmem:[#allocation7 + $0x70] sm:$0xff] }
  0x93   : > { %996 = vmatprep.subr.bf16.mxu0 %v1375_v0  ;;  %v1036_v45 = vpack.c.bf16 %v485_v41, %v484_v40  ;;  %v1009_v46 = vpack.c.bf16 %v391_v44, %v390_v43  ;;  %v393_v48 = vld [vmem:[#allocation7 + $0x78] sm:$0xff]  ;;  %v571_v51 = vld [vmem:[#allocation10] sm:$0xff]  ;;  %v572_v52 = vld [vmem:[#allocation10 + $0x8] sm:$0xff]  ;;  %p1287_p0 = pnand %p1286_p9, %p1280_p3 }
  0x94   : > { %1022 = vmatpush3.bf16.msra.mxu1 %v1021_v14  ;;  %v376_v49 = vld [vmem:[%s1630_s15] sm:$0xff]  ;;  %v1012_v50 = vpack.c.bf16 %v393_v48, %v392_v47  ;;  %v1039_v53 = vpack.c.bf16 %v572_v52, %v571_v51  ;;  %v575_v57 = vld [vmem:[#allocation10 + $0x20] sm:$0xff]  ;;  %v576_v58 = vld [vmem:[#allocation10 + $0x28] sm:$0xff] }
  0x95   : > { %1023 = vmatprep.subr.bf16.mxu1 %v1375_v0  ;;  %v573_v54 = vld [vmem:[#allocation10 + $0x10] sm:$0xff]  ;;  %v574_v55 = vld [vmem:[#allocation10 + $0x18] sm:$0xff]  ;;  %v1045_v59 = vpack.c.bf16 %v576_v58, %v575_v57  ;;  %v579_v63 = vld [vmem:[#allocation10 + $0x40] sm:$0xff] }
  0x96   : > { %998 = vmatpush3.bf16.msra.mxu0 %v997_v24  ;;  %v1042_v56 = vpack.c.bf16 %v574_v55, %v573_v54  ;;  %v577_v60 = vld [vmem:[#allocation10 + $0x30] sm:$0xff]  ;;  %v578_v61 = vld [vmem:[#allocation10 + $0x38] sm:$0xff]  ;;  %v580_v2 = vld [vmem:[#allocation10 + $0x48] sm:$0xff] }
  0x97   : > { %999 = vmatprep.subr.bf16.mxu0 %v1375_v0  ;;  %v1048_v62 = vpack.c.bf16 %v578_v61, %v577_v60  ;;  %v1051_v3 = vpack.c.bf16 %v580_v2, %v579_v63  ;;  %v582_v4 = vld [vmem:[#allocation10 + $0x58] sm:$0xff]  ;;  %v583_v6 = vld [vmem:[#allocation10 + $0x60] sm:$0xff]  ;;  %v584_v7 = vld [vmem:[#allocation10 + $0x68] sm:$0xff] }
  0x98   : > { %1025 = vmatpush3.bf16.msra.mxu1 %v1024_v21  ;;  %v1057_v8 = vpack.c.bf16 %v584_v7, %v583_v6  ;;  %v585_v9 = vld [vmem:[#allocation10 + $0x70] sm:$0xff]  ;;  %v586_v10 = vld [vmem:[#allocation10 + $0x78] sm:$0xff] }
  0x99   : > { %1026 = vmatprep.subr.bf16.mxu1 %v1375_v0  ;;  %v1060_v11 = vpack.c.bf16 %v586_v10, %v585_v9  ;;  %v829_v14 = vld [vmem:[%s1735_s2] ss:$0 sm:$0xff] }
  0x9a   : > { %1001 = vmatpush3.bf16.msra.mxu0 %v1000_v30 }
  0x9b   : > { %1002 = vmatprep.subr.bf16.mxu0 %v1375_v0 }
  0x9c   : > { %1028 = vmatpush3.bf16.msra.mxu1 %v1027_v27 }
  0x9d   : > { %1029 = vmatprep.subr.bf16.mxu1 %v1375_v0 }
  0x9e   : > { %1004 = vmatpush3.bf16.msra.mxu0 %v1003_v36 }
  0x9f   : > { %1005 = vmatprep.subr.bf16.mxu0 %v1375_v0 }
  0xa0   : > { %1031 = vmatpush3.bf16.msra.mxu1 %v1030_v33 }
  0xa1   : > { %1032 = vmatprep.subr.bf16.mxu1 %v1375_v0 }
  0xa2   : > { %1007 = vmatpush3.bf16.msra.mxu0 %v1006_v42 }
  0xa3   : > { %1008 = vmatprep.subr.bf16.mxu0 %v1375_v0 }
  0xa4   : > { %1034 = vmatpush3.bf16.msra.mxu1 %v1033_v39 }
  0xa5   : > { %1035 = vmatprep.subr.bf16.mxu1 %v1375_v0 }
  0xa6   : > { %1010 = vmatpush3.bf16.msra.mxu0 %v1009_v46 }
  0xa7   : > { %1011 = vmatprep.subr.bf16.mxu0 %v1375_v0 }
  0xa8   : > { %1037 = vmatpush3.bf16.msra.mxu1 %v1036_v45 }
  0xaa   : > { %1013 = vmatpush3.bf16.msra.mxu0 %v1012_v50 }
  0xab   : > { %953 = vmatmul.mubr.f32.vlgmr.msra.gmra.mrb[0].mxu1 %v376_v49  ;;  %1038 = vmatprep.subr.bf16.mxu0 %v1375_v0 }
  0xad   : > { %918 = vmatmul.mubr.f32.vlgmr.msra.gmra.mrb[0].mxu0 %v376_v49 }
  0xae   : > { %1040 = vmatpush3.bf16.msra.mxu0 %v1039_v53  ;;  %987 = vmatprep.mubr.msk.f32.mxu0 %vm1376_vm0, %v1377_v1  ;;  %v581_v1 = vld [vmem:[#allocation10 + $0x50] sm:$0xff] }
  0xaf   : > { %1041 = vmatprep.subr.bf16.mxu0 %v1375_v0  ;;  %v1054_v5 = vpack.c.bf16 %v582_v4, %v581_v1 }
  0xb2   : > { %1043 = vmatpush3.bf16.msra.mxu0 %v1042_v56 }
  0xb3   : > { %1044 = vmatprep.subr.bf16.mxu0 %v1375_v0 }
  0xb6   : > { %1046 = vmatpush3.bf16.msra.mxu0 %v1045_v59 }
  0xb7   : > { %1047 = vmatprep.subr.bf16.mxu0 %v1375_v0 }
  0xba   : > { %1049 = vmatpush3.bf16.msra.mxu0 %v1048_v62 }
  0xbb   : > { %1050 = vmatprep.subr.bf16.mxu0 %v1375_v0 }
  0xbe   : > { %1052 = vmatpush3.bf16.msra.mxu0 %v1051_v3 }
  0xbf   : > { %1053 = vmatprep.subr.bf16.mxu0 %v1375_v0 }
  0xc2   : > { %1055 = vmatpush3.bf16.msra.mxu0 %v1054_v5 }
  0xc3   : > { %1056 = vmatprep.subr.bf16.mxu0 %v1375_v0 }
  0xc6   : > { %1058 = vmatpush3.bf16.msra.mxu0 %v1057_v8 }
  0xc7   : > { %1059 = vmatprep.subr.bf16.mxu0 %v1375_v0 }
  0xca   : > { %1061 = vmatpush3.bf16.msra.mxu0 %v1060_v11 }
 0x17e   : > { %v552_v12 = vpop.f32.mrb[0].mxu1 }
 0x17f   : > { %v954_v13 = vpop.f32.mrb[1].mxu1  ;;  %988 = vmatmul.mubr.f32.vlgmr.msra.gmra.mrb[0].mxu0 %v552_v12 }
 0x252   : > { %v653_v15 = vpop.f32.mrb[0].mxu0 }
 0x253   : > { %v1062_v16 = vadd.f32 %v829_v14, %v653_v15  ;;  %v989_v17 = vpop.f32.mrb[1].mxu0 }
 0x255   : > { %659 = vst [vmem:[%s350_s27] sm:$0xff] %v1062_v16 }
 0x256   : > { %1290 = shalt.err (!%p1287_p0)
}
 0x257   : > { %s1291_s25 = scalar_lea.hbm %s1684_s12, 128  ;;  %s1295_s24 = scalar_lea.hbm %s1738_s5, 256 }
 0x258   : > { %p1292_p4 = scmp.ne.s32.totalorder %s1684_s12, %s1291_s25  ;;  %p1296_p1 = scmp.lt.u32.totalorder %s1684_s12, %s1738_s5 }
 0x259   : > { %p1297_p12 = scmp.lt.u32.totalorder %s1295_s24, %s1291_s25  ;;  %p1299_p13 = scmp.lt.u32.totalorder %s1291_s25, %s1684_s12 }
 0x25a   : > { %p1293_p2 = pnand %p1292_p4, %p1569_p10 }
 0x25b   : > { %p1298_p11 = por %p1297_p12, %p1296_p1 }
 0x25c   : > { %p1294_p8 = pneg %p1293_p2 }
 0x25d   : > { %p1300_p6 = por %p1299_p13, %p1298_p11 }
 0x25f   : > { %p1301_p3 = pnand %p1300_p6, %p1294_p8 }
 0x261   : > { %1304 = shalt.err (!%p1301_p3)
}
 0x262   : > { %1079 = dma.vmem_to_hbm [thread:$0]  (%p1569_p10), %s1686_s6, 128, %s1684_s12, %s667_s11  }
 0x263 PF: > { %s1760_s28 = sld [smem:[#allocation17_spill]]  ;;  %s1761_s30 = sld [smem:[#allocation18_spill]] }
 0x264   : > { %p1763_p7 = scmp.ge.s32.totalorder %s1367_s23, 2 }
 0x269   : > { %s693_s27 = sand.u32 1, %s1760_s28   ;;  %p1762_p5 = scmp.ne.s32.totalorder %s1761_s30, 0 }
 0x26a   : > { %s694_s9 = scalar_lea.sflag [#allocation6], %s693_s27 }
 0x26b   : > { %p1096_p9 = pnand %p1763_p7, %p1762_p5 }
 0x26d   : > { %1342 = dma.done.wait (!%p1096_p9), %s694_s9, 128  }
 0x26e   : > { %1344 = vsyncadd (!%p1096_p9), %s694_s9, 4294967168  ;;  %s23_s23 = sadd.s32 1, %s1367_s23   ;;  %s1764_s18 = smov %s1351_s19 }
 0x26f   : > { %p20_p0 = scmp.ge.s32.totalorder %s23_s23, 4   ;;  %s1765_s19 = smov %s1355_s20 }
 0x270   : > { %s1766_s20 = smov %s1581_s13  ;;  %s1767_s21 = smov %s1363_s22 }
 0x271   : > { %s1768_s22 = smov %s1770_s8  ;;  %22 = sbr.rel (!%p20_p0) target bundleno = 8 (0x8), region = 123 }
 0x278   :  { %699 = vsyncpa [#allocation5], 1 }
 0x279   :  { %701 = vsyncpa [#allocation5 + $0x1], 1 }
 0x27a   :  { %702 = vsyncpa [#allocation8], 1 }
 0x27b   :  { %703 = vsyncpa [#allocation11], 1 }
 0x27c   :  { %704 = vsyncpa [#allocation6], 1 }
 0x27d   :  { %706 = vsyncpa [#allocation6 + $0x1], 1 }

</bundles_post_ra>
